<compile_context>
chip_gen: v5e
topology: v5e:2x2
jax: 0.10.0
libtpu: 0.0.40
codegen_flags: <defaults>
</compile_context>

<pallas_src>
import functools

import jax
import jax.numpy as jnp
from jax.experimental import pallas as pl
from jax.experimental.pallas import tpu as pltpu


_LANE = 128


def _round_up(x, m):
    return ((x + m - 1) // m) * m


def _mlp_kernel(*refs, num_layers, apply_sigmoid):
    """Fused MLP kernel.

    refs = (x_ref, w_0, b_0, w_1, b_1, ..., w_{L-1}, b_{L-1}, out_ref)
    Layers 0..L-2 are Linear+ReLU, layer L-1 is the final Linear (logits,
    zero-padded to a lane-dense width).
    """
    x_ref = refs[0]
    out_ref = refs[-1]
    param_refs = refs[1:-1]

    # x may arrive as bf16 (HBM-traffic optimization); compute in f32.
    h = x_ref[...].astype(jnp.float32)
    for layer in range(num_layers):
        w = param_refs[2 * layer][...].astype(jnp.float32)
        b = param_refs[2 * layer + 1][...].astype(jnp.float32)
        h = jnp.dot(h, w, preferred_element_type=jnp.float32)
        h = h + b  # (1, out) broadcasts over the batch tile
        if layer < num_layers - 1:
            h = jnp.maximum(h, 0.0)  # ReLU on hidden layers only
    if apply_sigmoid:
        h = jax.nn.sigmoid(h)
    out_ref[...] = h.astype(out_ref.dtype)


def surname_mlp_forward(x, params, *, apply_sigmoid=False,
                        x_stream_dtype=jnp.bfloat16):
    """Forward pass.

    params: list of (W, b) with W: (in, out) float32, b: (out,) float32.
    x_stream_dtype: dtype x is streamed from HBM in (bf16 halves DMA traffic;
    pass jnp.float32 for bit-exact f32 input).
    """
    batch, num_features = x.shape
    num_classes = params[-1][0].shape[1]
    num_layers = len(params)

    # --- batch tiling: large TM to amortize per-step overhead; single step
    # for small batches. TM is always a multiple of 8 (sublane constraint).
    tm = 1024 if batch > 1024 else _round_up(max(batch, 1), 8)
    n_steps = pl.cdiv(batch, tm)
    padded_batch = n_steps * tm

    # --- lane-dense output: pad the final layer to 128 output lanes.
    out_padded = _round_up(num_classes, _LANE)

    x_in = x.astype(x_stream_dtype)
    if padded_batch != batch:
        x_in = jnp.pad(x_in, ((0, padded_batch - batch), (0, 0)))

    flat_inputs = [x_in]
    in_specs = [pl.BlockSpec((tm, num_features), lambda i: (i, 0))]
    for li, (w, b) in enumerate(params):
        w2 = w
        b2 = b.reshape(1, -1)
        if li == num_layers - 1 and out_padded != num_classes:
            pad = out_padded - num_classes
            w2 = jnp.pad(w2, ((0, 0), (0, pad)))
            b2 = jnp.pad(b2, ((0, 0), (0, pad)))
        flat_inputs += [w2, b2]
        # Constant block index -> weights/biases stay resident in VMEM.
        in_specs += [
            pl.BlockSpec(w2.shape, lambda i: (0, 0)),
            pl.BlockSpec(b2.shape, lambda i: (0, 0)),
        ]

    flops = 2 * padded_batch * sum(w.shape[0] * w.shape[1] for w, _ in params)
    transcendentals = padded_batch * num_classes if apply_sigmoid else 0
    bytes_accessed = (
        x_in.size * x_in.dtype.itemsize
        + padded_batch * out_padded * 4
        + sum(w.size * 4 + b.size * 4 for w, b in params)
    )

    kernel = functools.partial(
        _mlp_kernel, num_layers=num_layers, apply_sigmoid=apply_sigmoid
    )

    out = pl.pallas_call(
        kernel,
        out_shape=jax.ShapeDtypeStruct((padded_batch, out_padded), jnp.float32),
        grid_spec=pltpu.PrefetchScalarGridSpec(
            num_scalar_prefetch=0,
            grid=(n_steps,),
            in_specs=in_specs,
            out_specs=pl.BlockSpec((tm, out_padded), lambda i: (i, 0)),
        ),
        compiler_params=pltpu.CompilerParams(
            # Batch steps are independent -> shard across TCs on v7x megacore.
            dimension_semantics=("parallel",),
        ),
        cost_estimate=pl.CostEstimate(
            flops=flops,
            transcendentals=transcendentals,
            bytes_accessed=bytes_accessed,
        ),
    )(*flat_inputs)

    logits = out[:batch, :num_classes]
    # torch's .squeeze(): drop all size-1 dims (no-op for batch>1, classes>1).
    return jnp.squeeze(logits)


def init_params(key, num_features, num_classes, hidden_layer_dim):
    """Deterministic parameter init mirroring the module's layer shapes."""
    dims = [num_features] + list(hidden_layer_dim or []) + [num_classes]
    params = []
    for i in range(len(dims) - 1):
        key, kw, kb = jax.random.split(key, 3)
        fan_in, fan_out = dims[i], dims[i + 1]
        bound = 1.0 / jnp.sqrt(fan_in)
        w = jax.random.uniform(
            kw, (fan_in, fan_out), jnp.float32, minval=-bound, maxval=bound
        )
        b = jax.random.uniform(
            kb, (fan_out,), jnp.float32, minval=-bound, maxval=bound
        )
        params.append((w, b))
    return params


if __name__ == "__main__":
    # Small shapes consistent with the module: an MLP over surname feature
    # vectors.  batch=8, num_features=32, hidden=[64, 32], num_classes=4.
    batch = 8
    num_features = 32
    num_classes = 4
    hidden_layer_dim = [64, 32]

    key = jax.random.PRNGKey(0)
    key, kx = jax.random.split(key)
    x = jax.random.normal(kx, (batch, num_features), dtype=jnp.float32)

    params = init_params(key, num_features, num_classes, hidden_layer_dim)

    logits = jax.block_until_ready(
        surname_mlp_forward(x, params, apply_sigmoid=False)
    )

    # Pure-JAX reference with the same bf16 rounding of the streamed input,
    # f32 math everywhere else (matches kernel semantics).
    h = x.astype(jnp.bfloat16).astype(jnp.float32)
    for li, (w, b) in enumerate(params):
        h = h @ w + b
        if li < len(params) - 1:
            h = jnp.maximum(h, 0.0)
    ref = jnp.squeeze(h)
    assert logits.shape == (batch, num_classes)
    assert jnp.allclose(logits, ref, atol=1e-5, rtol=1e-5)

    # Also exercise the apply_sigmoid=True path (sigmoid fused in-kernel).
    probs = jax.block_until_ready(
        surname_mlp_forward(x, params, apply_sigmoid=True)
    )
    assert jnp.allclose(probs, jax.nn.sigmoid(ref), atol=1e-5, rtol=1e-5)

    print("KERNEL_OK")
</pallas_src>

<mosaic_0001>
module attributes {stable_mosaic.version = 11 : i64} {
  func.func @_mlp_kernel(%arg0: i32, %arg1: memref<8x32xbf16, #tpu.memory_space<vmem>>, %arg2: memref<32x64xf32, #tpu.memory_space<vmem>>, %arg3: memref<1x64xf32, #tpu.memory_space<vmem>>, %arg4: memref<64x32xf32, #tpu.memory_space<vmem>>, %arg5: memref<1x32xf32, #tpu.memory_space<vmem>>, %arg6: memref<32x128xf32, #tpu.memory_space<vmem>>, %arg7: memref<1x128xf32, #tpu.memory_space<vmem>>, %arg8: memref<8x128xf32, #tpu.memory_space<vmem>>) attributes {dimension_semantics = [#tpu.dimension_semantics<parallel>], iteration_bounds = array<i64: 1>, scalar_prefetch = 0 : i64, scratch_operands = 0 : i64, tpu.core_type = #tpu.core_type<tc>, window_params = [{transform_indices = @transform_0, window_bounds = array<i64: 8, 32>}, {pipeline_mode = #tpu.pipeline_mode<synchronous>, transform_indices = @transform_1, window_bounds = array<i64: 32, 64>}, {pipeline_mode = #tpu.pipeline_mode<synchronous>, transform_indices = @transform_2, window_bounds = array<i64: 1, 64>}, {pipeline_mode = #tpu.pipeline_mode<synchronous>, transform_indices = @transform_3, window_bounds = array<i64: 64, 32>}, {pipeline_mode = #tpu.pipeline_mode<synchronous>, transform_indices = @transform_4, window_bounds = array<i64: 1, 32>}, {pipeline_mode = #tpu.pipeline_mode<synchronous>, transform_indices = @transform_5, window_bounds = array<i64: 32, 128>}, {pipeline_mode = #tpu.pipeline_mode<synchronous>, transform_indices = @transform_6, window_bounds = array<i64: 1, 128>}, {transform_indices = @transform_7, window_bounds = array<i64: 8, 128>}]} {
    %c0 = arith.constant 0 : index
    %c0_0 = arith.constant 0 : index
    %0 = vector.load %arg1[%c0, %c0_0] : memref<8x32xbf16, #tpu.memory_space<vmem>>, vector<8x32xbf16>
    %1 = arith.extf %0 : vector<8x32xbf16> to vector<8x32xf32>
    %c0_1 = arith.constant 0 : index
    %c0_2 = arith.constant 0 : index
    %2 = vector.load %arg2[%c0_1, %c0_2] : memref<32x64xf32, #tpu.memory_space<vmem>>, vector<32x64xf32>
    %c0_3 = arith.constant 0 : index
    %c0_4 = arith.constant 0 : index
    %3 = vector.load %arg3[%c0_3, %c0_4] : memref<1x64xf32, #tpu.memory_space<vmem>>, vector<1x64xf32>
    %cst = arith.constant dense<0.000000e+00> : vector<8x64xf32>
    %4 = tpu.matmul %1, %2, %cst {dimension_numbers = #tpu.dot_dimension_numbers<[1], [0], [0], [1], [0, 0, 1, 1], [], []>} : vector<8x32xf32>, vector<32x64xf32>, vector<8x64xf32> -> vector<8x64xf32>
    %5 = vector.broadcast %3 : vector<1x64xf32> to vector<8x64xf32>
    %6 = arith.addf %4, %5 : vector<8x64xf32>
    %cst_5 = arith.constant 0.000000e+00 : f32
    %7 = vector.broadcast %cst_5 : f32 to vector<8x64xf32>
    %8 = arith.maximumf %6, %7 : vector<8x64xf32>
    %c0_6 = arith.constant 0 : index
    %c0_7 = arith.constant 0 : index
    %9 = vector.load %arg4[%c0_6, %c0_7] : memref<64x32xf32, #tpu.memory_space<vmem>>, vector<64x32xf32>
    %c0_8 = arith.constant 0 : index
    %c0_9 = arith.constant 0 : index
    %10 = vector.load %arg5[%c0_8, %c0_9] : memref<1x32xf32, #tpu.memory_space<vmem>>, vector<1x32xf32>
    %cst_10 = arith.constant dense<0.000000e+00> : vector<8x32xf32>
    %11 = tpu.matmul %8, %9, %cst_10 {dimension_numbers = #tpu.dot_dimension_numbers<[1], [0], [0], [1], [0, 0, 1, 1], [], []>} : vector<8x64xf32>, vector<64x32xf32>, vector<8x32xf32> -> vector<8x32xf32>
    %12 = vector.broadcast %10 : vector<1x32xf32> to vector<8x32xf32>
    %13 = arith.addf %11, %12 : vector<8x32xf32>
    %cst_11 = arith.constant 0.000000e+00 : f32
    %14 = vector.broadcast %cst_11 : f32 to vector<8x32xf32>
    %15 = arith.maximumf %13, %14 : vector<8x32xf32>
    %c0_12 = arith.constant 0 : index
    %c0_13 = arith.constant 0 : index
    %16 = vector.load %arg6[%c0_12, %c0_13] : memref<32x128xf32, #tpu.memory_space<vmem>>, vector<32x128xf32>
    %c0_14 = arith.constant 0 : index
    %c0_15 = arith.constant 0 : index
    %17 = vector.load %arg7[%c0_14, %c0_15] : memref<1x128xf32, #tpu.memory_space<vmem>>, vector<1x128xf32>
    %cst_16 = arith.constant dense<0.000000e+00> : vector<8x128xf32>
    %18 = tpu.matmul %15, %16, %cst_16 {dimension_numbers = #tpu.dot_dimension_numbers<[1], [0], [0], [1], [0, 0, 1, 1], [], []>} : vector<8x32xf32>, vector<32x128xf32>, vector<8x128xf32> -> vector<8x128xf32>
    %19 = vector.broadcast %17 : vector<1x128xf32> to vector<8x128xf32>
    %20 = arith.addf %18, %19 : vector<8x128xf32>
    %c0_17 = arith.constant 0 : index
    %c0_18 = arith.constant 0 : index
    %21 = vector.load %arg8[%c0_17, %c0_18] : memref<8x128xf32, #tpu.memory_space<vmem>>, vector<8x128xf32>
    tpu.vector_store %arg8[%c0_17, %c0_18], %20 {strides = array<i32>} : memref<8x128xf32, #tpu.memory_space<vmem>>, vector<8x128xf32>,
    return
  }
  func.func @transform_0(%arg0: i32) -> (i32, i32) {
    %c0_i32 = arith.constant 0 : i32
    %c0_i32_0 = arith.constant 0 : i32
    return %arg0, %c0_i32 : i32, i32
  }
  func.func @transform_1(%arg0: i32) -> (i32, i32) {
    %c0_i32 = arith.constant 0 : i32
    %c0_i32_0 = arith.constant 0 : i32
    %c0_i32_1 = arith.constant 0 : i32
    return %c0_i32, %c0_i32_0 : i32, i32
  }
  func.func @transform_2(%arg0: i32) -> (i32, i32) {
    %c0_i32 = arith.constant 0 : i32
    %c0_i32_0 = arith.constant 0 : i32
    %c0_i32_1 = arith.constant 0 : i32
    return %c0_i32, %c0_i32_0 : i32, i32
  }
  func.func @transform_3(%arg0: i32) -> (i32, i32) {
    %c0_i32 = arith.constant 0 : i32
    %c0_i32_0 = arith.constant 0 : i32
    %c0_i32_1 = arith.constant 0 : i32
    return %c0_i32, %c0_i32_0 : i32, i32
  }
  func.func @transform_4(%arg0: i32) -> (i32, i32) {
    %c0_i32 = arith.constant 0 : i32
    %c0_i32_0 = arith.constant 0 : i32
    %c0_i32_1 = arith.constant 0 : i32
    return %c0_i32, %c0_i32_0 : i32, i32
  }
  func.func @transform_5(%arg0: i32) -> (i32, i32) {
    %c0_i32 = arith.constant 0 : i32
    %c0_i32_0 = arith.constant 0 : i32
    %c0_i32_1 = arith.constant 0 : i32
    return %c0_i32, %c0_i32_0 : i32, i32
  }
  func.func @transform_6(%arg0: i32) -> (i32, i32) {
    %c0_i32 = arith.constant 0 : i32
    %c0_i32_0 = arith.constant 0 : i32
    %c0_i32_1 = arith.constant 0 : i32
    return %c0_i32, %c0_i32_0 : i32, i32
  }
  func.func @transform_7(%arg0: i32) -> (i32, i32) {
    %c0_i32 = arith.constant 0 : i32
    %c0_i32_0 = arith.constant 0 : i32
    return %arg0, %c0_i32 : i32, i32
  }
}

</mosaic_0001>

<bundles_post_ra>
// kernel: tpu_custom_call.1
= control target key start
LH: loop header
LB: loop body
LE: loop exit
PB: predicated region body
PF: predicated region fallthrough
CT: control target
= control target key end

     0   :  { %s286_s0 = inlined_call_operand.vmem [shape: bf16[8,32], index: 0, kind: input, shape index: {}]   ;;  %s287_s1 = inlined_call_operand.vmem [shape: f32[32,64], index: 1, kind: input, shape index: {}]   ;;  %s288_s2 = inlined_call_operand.vmem [shape: f32[1,64], index: 2, kind: input, shape index: {}]   ;;  %s289_s3 = inlined_call_operand.vmem [shape: f32[64,32], index: 3, kind: input, shape index: {}]   ;;  %s290_s4 = inlined_call_operand.vmem [shape: f32[1,32], index: 4, kind: input, shape index: {}]   ;;  %s291_s5 = inlined_call_operand.vmem [shape: f32[32,128], index: 5, kind: input, shape index: {}]   ;;  %s292_s6 = inlined_call_operand.vmem [shape: f32[1,128], index: 6, kind: input, shape index: {}]   ;;  %s293_s7 = inlined_call_operand.hbm [shape: f32[8,128], index: 7, kind: output, shape index: {}]  }
   0x1   :  { %v32_v0 = vld [vmem:[%s287_s1 + $0x18] sm:$0xff]  ;;  %v31_v1 = vld [vmem:[%s287_s1 + $0x10] sm:$0xff]  ;;  %v27_v2 = vld [vmem:[%s286_s0] sm:$0xf] }
   0x2   :  { %53 = vmatpush.msra.mxu0 %v32_v0  ;;  %v69_v3 = vld [vmem:[%s289_s3 + $0x38] sm:$0xff]  ;;  %v30_v4 = vld [vmem:[%s287_s1 + $0x8] sm:$0xff]  ;;  %v68_v5 = vld [vmem:[%s289_s3 + $0x30] sm:$0xff]  ;;  %v28_v8 = vunpack.c.l.bf16 %v27_v2 }
   0x3   :  { %86 = vmatpush.msra.mxu1 %v69_v3  ;;  %v29_v6 = vld [vmem:[%s287_s1] sm:$0xff]  ;;  %v67_v7 = vld [vmem:[%s289_s3 + $0x28] sm:$0xff] }
   0x4   :  { %54 = vmatpush.msra.mxu0 %v31_v1 }
   0x5   :  { %87 = vmatpush.msra.mxu1 %v68_v5 }
   0x6   :  { %12 = vsyncpa [#allocation3], 0  ;;  %55 = vmatpush.msra.mxu0 %v30_v4  ;;  %vm37_vm0 = vcmask 261120   ;;  %v66_v9 = vld [vmem:[%s289_s3 + $0x20] sm:$0xff]  ;;  %v65_v10 = vld [vmem:[%s289_s3 + $0x18] sm:$0xff]  ;;  %vm74_vm1 = vcmask 523264  }
   0x7   :  { %88 = vmatpush.msra.mxu1 %v67_v7  ;;  %v64_v11 = vld [vmem:[%s289_s3 + $0x10] sm:$0xff]  ;;  %v63_v12 = vld [vmem:[%s289_s3 + $0x8] sm:$0xff]  ;;  %v62_v13 = vld [vmem:[%s289_s3] sm:$0xff]  ;;  %s180_s14 = smov [#allocation2]  }
   0x8   :  { %56 = vmatpush.msra.mxu0 %v29_v6  ;;  %v102_v14 = vld [vmem:[%s291_s5 + $0x18] sm:$0xff]  ;;  %v151_v15 = vld [vmem:[%s288_s2] ss:$0 sm:$0xff]  ;;  %v101_v19 = vld [vmem:[%s291_s5 + $0x10] sm:$0xff]  ;;  %s136_s15 = sshll.u32 %s180_s14, 4  ;;  %s137_s15 = int_to_ptr.vmem [resolvable:$true] %s136_s15 }
   0x9   :  { %147 = vmatmul.msk.f32.vlgmr.msra.gmra.mxu0 %vm37_vm0, %v28_v8  ;;  %89 = vmatpush.msra.mxu1 %v66_v9  ;;  %v100_v20 = vld [vmem:[%s291_s5 + $0x8] sm:$0xff]  ;;  %v99_v21 = vld [vmem:[%s291_s5] sm:$0xff]  ;;  %s138_s5 = sshll.u32 %s293_s7, 4  ;;  %s139_s5 = int_to_ptr.hbm [resolvable:$true] %s138_s5 }
   0xa   :  { %122 = vmatpush.msra.mxu2 %v102_v14  ;;  %v152_v22 = vld [vmem:[%s290_s4] ss:$0 sm:$0xff] }
   0xb   :  { %90 = vmatpush.msra.mxu1 %v65_v10  ;;  %v153_v26 = vld [vmem:[%s292_s6] ss:$0 sm:$0xff] }
   0xc   :  { %123 = vmatpush.msra.mxu2 %v101_v19 }
   0xd   :  { %91 = vmatpush.msra.mxu1 %v64_v11 }
   0xe   :  { %124 = vmatpush.msra.mxu2 %v100_v20 }
   0xf   :  { %92 = vmatpush.msra.mxu1 %v63_v12 }
  0x10   :  { %125 = vmatpush.msra.mxu2 %v99_v21 }
  0x11   :  { %93 = vmatpush.msra.mxu1 %v62_v13 }
  0x86   :  { %v58_v16 = vpop.f32.mrf.mxu0 }
  0x87   :  { %v59_v17 = vadd.f32 %v151_v15, %v58_v16 }
  0x89   :  { %v61_v18 = vmax.f32 %v59_v17, 0.0 }
  0x8b   :  { %148 = vmatmul.msk.f32.vlgmr.msra.gmra.mxu1 %vm74_vm1, %v61_v18 }
 0x108   :  { %v95_v23 = vpop.f32.mrf.mxu1 }
 0x109   :  { %v96_v24 = vadd.f32 %v152_v22, %v95_v23 }
 0x10b   :  { %v98_v25 = vmax.f32 %v96_v24, 0.0 }
 0x10d   :  { %149 = vmatmul.msk.f32.vlgmr.msra.gmra.mxu2 %vm37_vm0, %v98_v25 }
 0x190   :  { %v127_v27 = vpop.f32.mrf.mxu2 }
 0x191   :  { %v128_v28 = vadd.f32 %v153_v26, %v127_v27 }
 0x193   :  { %130 = vst [vmem:[#allocation2] sm:$0xff] %v128_v28 }
 0x194   :  { %141 = dma.vmem_to_hbm [thread:$0]  %s137_s15, 128, %s139_s5, [#allocation3]  }
 0x195   :  { %178 = dma.done.wait [#allocation3], 128  }
 0x196   :  { %179 = vsyncadd [#allocation3], 4294967168 }
 0x197   :  { %146 = vsyncpa [#allocation3], 1 }

</bundles_post_ra>
